<compile_context>
chip_gen: v5e
topology: v5e:2x2
jax: 0.10.0
libtpu: 0.0.40
codegen_flags: <defaults>
</compile_context>

<pallas_src>
import math

import jax
import jax.numpy as jnp
from jax import lax
from jax.experimental import pallas as pl
from jax.experimental.pallas import tpu as pltpu


def _lora_linear_kernel(x_ref, w_ref, bias_ref, a_ref, xb_ref, out_ref, *acc_scratch):
    """One (i, j, k) grid step of  out = x @ W^T + bias + (scale * x @ B) @ A.

    x_ref:    [tm, tk]   activation tile                     index (i, k)
    w_ref:    [tn, tk]   base weight tile (row-major [N,K])  index (j, k)
    bias_ref: [1,  tn]   bias column tile                    index (0, j)
    a_ref:    [Rp, tn]   lora_A column tile                  index (0, j)
    xb_ref:   [tm, Rp]   precomputed scale*(x @ lora_B) tile index (i, 0)
    out_ref:  [tm, tn]   output tile                         index (i, j)
    acc_scratch: optional [tm, tn] f32 accumulator; only present when the output
                 dtype is not f32 — otherwise out_ref itself is the accumulator.
    """
    acc_ref = acc_scratch[0] if acc_scratch else out_ref
    k = pl.program_id(2)

    @pl.when(k == 0)
    def _():
        acc_ref[...] = jnp.zeros_like(acc_ref)

    # Base matmul: x_tile @ W_tile^T — contract on the shared K axis directly,
    # no transposed weight copy is ever materialized (host or VMEM).
    acc_ref[...] += lax.dot_general(
        x_ref[...], w_ref[...],
        dimension_numbers=(((1,), (1,)), ((), ())),
        preferred_element_type=jnp.float32)

    @pl.when(k == pl.num_programs(2) - 1)
    def _():
        # LoRA epilogue: a single tiny [tm,Rp]@[Rp,tn] MXU pass per (i, j) tile,
        # inputs kept in their native (e.g. bf16) dtype, f32 accumulation.
        delta = jnp.dot(xb_ref[...], a_ref[...],
                        preferred_element_type=jnp.float32)
        out_ref[...] = (acc_ref[...].astype(jnp.float32)
                        + bias_ref[...].astype(jnp.float32)
                        + delta).astype(out_ref.dtype)


def _round_up(v, m):
    return ((v + m - 1) // m) * m


def _pad2d(arr, target_shape):
    pads = [(0, t - s) for s, t in zip(arr.shape, target_shape)]
    if all(p == (0, 0) for p in pads):
        return arr
    return jnp.pad(arr, pads)


def lora_linear_forward(x, weight, bias, lora_A, lora_B, lora_rank, lora_alpha,
                        *, tm=256, tn=512, tk=1024, vmem_limit_bytes=None):
    """Pallas TPU forward for BaseLayerWithLoRA (unmerged / training path).

    x:      [batch, seq, in_dim]
    weight: [out_dim, in_dim]   (PyTorch nn.Linear layout — NOT transposed on host)
    bias:   [out_dim]
    lora_A: [rank, in_dim]
    lora_B: [out_dim, rank]
    Returns (out [batch, seq, out_dim], output_bias=None).
    """
    Bsz, S, K = x.shape
    N = weight.shape[0]
    R = lora_A.shape[0]
    M = Bsz * S

    # The module's `x @ (lora_B @ lora_A)` only type-checks when in_dim == out_dim.
    assert K == N, "BaseLayerWithLoRA.forward requires in_dim == out_dim"

    scale = float(lora_alpha) / float(lora_rank) if lora_alpha != lora_rank else 1.0

    # Full-dim blocks for small problems, aligned tiles otherwise.
    tm = M if M <= tm else tm
    tn = N if N <= tn else tn
    tk = K if K <= tk else tk

    # Zero-pad so every grid axis divides evenly; padding is mathematically inert
    # (zero rows/cols contribute nothing; extra output rows/cols are sliced off).
    Mp = _round_up(M, tm)
    Np = _round_up(N, tn)
    Kp = _round_up(K, tk)
    Rp = _round_up(R, 8)          # sublane-friendly rank padding (zeros are inert)

    x_flat = x.reshape(M, K)

    # LoRA left factor precomputed on the host graph: xb = scale * (x @ lora_B).
    # [M, R] is tiny; this keeps the rank-R matmul out of the kernel's k-loop and
    # lets both M and N stay megacore-parallel on v7x.  Valid reassociation of the
    # module's x @ (B @ A) into (x @ B) @ A since in_dim == out_dim.
    xb = jnp.dot(x_flat, lora_B, preferred_element_type=jnp.float32)
    if scale != 1.0:
        xb = xb * scale
    xb = xb.astype(lora_A.dtype)

    x2d    = _pad2d(x_flat, (Mp, Kp))
    w_p    = _pad2d(weight, (Np, Kp))
    bias_p = _pad2d(bias.reshape(1, N), (1, Np))
    a_p    = _pad2d(lora_A, (Rp, Np))     # lora_A: [R, in_dim] == [R, N]
    xb_p   = _pad2d(xb, (Mp, Rp))

    out_dtype = x.dtype
    # f32 output -> accumulate straight into the resident output tile (no scratch).
    use_out_as_acc = (out_dtype == jnp.float32)
    scratch_shapes = [] if use_out_as_acc else [pltpu.VMEM((tm, tn), jnp.float32)]

    grid = (Mp // tm, Np // tn, Kp // tk)

    out2d = pl.pallas_call(
        _lora_linear_kernel,
        out_shape=jax.ShapeDtypeStruct((Mp, Np), out_dtype),
        grid_spec=pltpu.PrefetchScalarGridSpec(
            num_scalar_prefetch=0,
            grid=grid,
            in_specs=[
                pl.BlockSpec((tm, tk), lambda i, j, k: (i, k)),   # x
                pl.BlockSpec((tn, tk), lambda i, j, k: (j, k)),   # W row-major [N,K]
                pl.BlockSpec((1, tn),  lambda i, j, k: (0, j)),   # bias cols
                pl.BlockSpec((Rp, tn), lambda i, j, k: (0, j)),   # lora_A cols
                pl.BlockSpec((tm, Rp), lambda i, j, k: (i, 0)),   # precomputed x@B
            ],
            out_specs=pl.BlockSpec((tm, tn), lambda i, j, k: (i, j)),
            scratch_shapes=scratch_shapes,
        ),
        compiler_params=pltpu.CompilerParams(
            dimension_semantics=("parallel", "parallel", "arbitrary"),
            vmem_limit_bytes=vmem_limit_bytes,
        ),
    )(x2d, w_p, bias_p, a_p, xb_p)

    out = out2d[:M, :N].reshape(Bsz, S, N)
    output_bias = None   # base layer applies the bias itself (skip_bias_add=False)
    # TODO(synk): DTensor/FSDP sharding, CPU weight cache, and merge/unmerge state
    # management are host-side bookkeeping with no kernel equivalent.
    return out, output_bias


def _kaiming_uniform(key, shape, a=math.sqrt(5), dtype=jnp.float32):
    # matches torch.nn.init.kaiming_uniform_ bound for a 2D weight
    fan_in = shape[1]
    gain = math.sqrt(2.0 / (1.0 + a * a))
    bound = gain * math.sqrt(3.0 / fan_in)
    return jax.random.uniform(key, shape, dtype=dtype, minval=-bound, maxval=bound)


def _reference(x, weight, bias, lora_A, lora_B, lora_rank, lora_alpha):
    hp = jax.lax.Precision.HIGHEST
    base = jnp.einsum("bsk,nk->bsn", x, weight, precision=hp) + bias
    ba = jnp.matmul(lora_B, lora_A, precision=hp)            # [N, K]
    delta = jnp.einsum("bsn,nk->bsk", x, ba, precision=hp)   # x @ (B @ A), N == K
    if lora_alpha != lora_rank:
        delta = delta * (lora_alpha / lora_rank)
    return base + delta


if __name__ == "__main__":
    key = jax.random.PRNGKey(0)

    # --- Case 1: small, single-tile, alpha != rank (scaling branch) ---
    batch, seq, dim = 2, 8, 32
    lora_rank, lora_alpha = 4, 8
    kx, kw, kb, ka, kbb = jax.random.split(key, 5)
    x = jax.random.normal(kx, (batch, seq, dim), dtype=jnp.float32)
    weight = _kaiming_uniform(kw, (dim, dim))
    bias = jax.random.uniform(kb, (dim,), dtype=jnp.float32,
                              minval=-1.0 / math.sqrt(dim),
                              maxval=1.0 / math.sqrt(dim))
    lora_A = _kaiming_uniform(ka, (lora_rank, dim))
    lora_B = _kaiming_uniform(kbb, (dim, lora_rank))

    out, output_bias = lora_linear_forward(x, weight, bias, lora_A, lora_B,
                                           lora_rank, lora_alpha)
    out = jax.block_until_ready(out)
    ref = _reference(x, weight, bias, lora_A, lora_B, lora_rank, lora_alpha)
    assert out.shape == (batch, seq, dim)
    assert output_bias is None
    assert jnp.allclose(out, ref, atol=1e-4, rtol=1e-4), "case1 mismatch vs reference"

    # --- Case 2: multi-tile grid (K accumulation, N tiling, M padding), alpha == rank ---
    batch2, seq2, dim2 = 2, 72, 256      # M = 144 -> padded to 256 with tm=128
    rank2, alpha2 = 4, 4                 # scale branch skipped (alpha == rank)
    ks = jax.random.split(key, 6)
    x2 = jax.random.normal(ks[0], (batch2, seq2, dim2), dtype=jnp.float32)
    w2 = _kaiming_uniform(ks[1], (dim2, dim2))
    b2 = jax.random.uniform(ks[2], (dim2,), dtype=jnp.float32,
                            minval=-1.0 / math.sqrt(dim2),
                            maxval=1.0 / math.sqrt(dim2))
    A2 = _kaiming_uniform(ks[3], (rank2, dim2))
    B2 = _kaiming_uniform(ks[4], (dim2, rank2))

    out2, ob2 = lora_linear_forward(x2, w2, b2, A2, B2, rank2, alpha2,
                                    tm=128, tn=128, tk=128)
    out2 = jax.block_until_ready(out2)
    ref2 = _reference(x2, w2, b2, A2, B2, rank2, alpha2)
    assert out2.shape == (batch2, seq2, dim2)
    assert ob2 is None
    assert jnp.allclose(out2, ref2, atol=1e-3, rtol=1e-3), "case2 mismatch vs reference"

    # --- Case 3: bf16 inputs (exercises the f32-scratch accumulator path) ---
    x3 = x2.astype(jnp.bfloat16)
    w3 = w2.astype(jnp.bfloat16)
    b3 = b2.astype(jnp.bfloat16)
    A3 = A2.astype(jnp.bfloat16)
    B3 = B2.astype(jnp.bfloat16)
    out3, ob3 = lora_linear_forward(x3, w3, b3, A3, B3, rank2, alpha2,
                                    tm=128, tn=128, tk=128)
    out3 = jax.block_until_ready(out3)
    ref3 = _reference(x3.astype(jnp.float32), w3.astype(jnp.float32),
                      b3.astype(jnp.float32), A3.astype(jnp.float32),
                      B3.astype(jnp.float32), rank2, alpha2)
    assert out3.dtype == jnp.bfloat16
    assert ob3 is None
    assert jnp.allclose(out3.astype(jnp.float32), ref3, atol=5e-2, rtol=5e-2), \
        "case3 mismatch vs reference"

    print("KERNEL_OK")
</pallas_src>

<mosaic_0001>
module attributes {stable_mosaic.version = 11 : i64} {
  func.func @_lora_linear_kernel(%arg0: i32, %arg1: i32, %arg2: i32, %arg3: memref<16x32xf32, #tpu.memory_space<vmem>>, %arg4: memref<32x32xf32, #tpu.memory_space<vmem>>, %arg5: memref<1x32xf32, #tpu.memory_space<vmem>>, %arg6: memref<8x32xf32, #tpu.memory_space<vmem>>, %arg7: memref<16x8xf32, #tpu.memory_space<vmem>>, %arg8: memref<16x32xf32, #tpu.memory_space<vmem>>) attributes {dimension_semantics = [#tpu.dimension_semantics<parallel>, #tpu.dimension_semantics<parallel>, #tpu.dimension_semantics<arbitrary>], iteration_bounds = array<i64: 1, 1, 1>, scalar_prefetch = 0 : i64, scratch_operands = 0 : i64, tpu.core_type = #tpu.core_type<tc>, window_params = [{transform_indices = @transform_0, window_bounds = array<i64: 16, 32>}, {transform_indices = @transform_1, window_bounds = array<i64: 32, 32>}, {transform_indices = @transform_2, window_bounds = array<i64: 1, 32>}, {transform_indices = @transform_3, window_bounds = array<i64: 8, 32>}, {transform_indices = @transform_4, window_bounds = array<i64: 16, 8>}, {transform_indices = @transform_5, window_bounds = array<i64: 16, 32>}]} {
    %c0_i32 = arith.constant 0 : i32
    %0 = arith.cmpi eq, %arg2, %c0_i32 : i32
    %1 = arith.extui %0 : i1 to i32
    %c0_i32_0 = arith.constant 0 : i32
    %2 = arith.cmpi ne, %1, %c0_i32_0 : i32
    scf.if %2 {
      %cst_10 = arith.constant 0.000000e+00 : f32
      %12 = vector.broadcast %cst_10 : f32 to vector<16x32xf32>
      %c0_11 = arith.constant 0 : index
      %c0_12 = arith.constant 0 : index
      %13 = vector.load %arg8[%c0_11, %c0_12] : memref<16x32xf32, #tpu.memory_space<vmem>>, vector<16x32xf32>
      tpu.vector_store %arg8[%c0_11, %c0_12], %12 {strides = array<i32>} : memref<16x32xf32, #tpu.memory_space<vmem>>, vector<16x32xf32>,
    } else {
    }
    %c0 = arith.constant 0 : index
    %c0_1 = arith.constant 0 : index
    %3 = vector.load %arg8[%c0, %c0_1] : memref<16x32xf32, #tpu.memory_space<vmem>>, vector<16x32xf32>
    %c0_2 = arith.constant 0 : index
    %c0_3 = arith.constant 0 : index
    %4 = vector.load %arg3[%c0_2, %c0_3] : memref<16x32xf32, #tpu.memory_space<vmem>>, vector<16x32xf32>
    %c0_4 = arith.constant 0 : index
    %c0_5 = arith.constant 0 : index
    %5 = vector.load %arg4[%c0_4, %c0_5] : memref<32x32xf32, #tpu.memory_space<vmem>>, vector<32x32xf32>
    %cst = arith.constant dense<0.000000e+00> : vector<16x32xf32>
    %6 = tpu.matmul %4, %5, %cst {dimension_numbers = #tpu.dot_dimension_numbers<[1], [1], [0], [0], [0, 0, 1, 0], [], []>} : vector<16x32xf32>, vector<32x32xf32>, vector<16x32xf32> -> vector<16x32xf32>
    %7 = arith.addf %3, %6 : vector<16x32xf32>
    %c0_6 = arith.constant 0 : index
    %c0_7 = arith.constant 0 : index
    %8 = vector.load %arg8[%c0_6, %c0_7] : memref<16x32xf32, #tpu.memory_space<vmem>>, vector<16x32xf32>
    tpu.vector_store %arg8[%c0_6, %c0_7], %7 {strides = array<i32>} : memref<16x32xf32, #tpu.memory_space<vmem>>, vector<16x32xf32>,
    %c0_i32_8 = arith.constant 0 : i32
    %9 = arith.cmpi eq, %arg2, %c0_i32_8 : i32
    %10 = arith.extui %9 : i1 to i32
    %c0_i32_9 = arith.constant 0 : i32
    %11 = arith.cmpi ne, %10, %c0_i32_9 : i32
    scf.if %11 {
      %c0_10 = arith.constant 0 : index
      %c0_11 = arith.constant 0 : index
      %12 = vector.load %arg7[%c0_10, %c0_11] : memref<16x8xf32, #tpu.memory_space<vmem>>, vector<16x8xf32>
      %c0_12 = arith.constant 0 : index
      %c0_13 = arith.constant 0 : index
      %13 = vector.load %arg6[%c0_12, %c0_13] : memref<8x32xf32, #tpu.memory_space<vmem>>, vector<8x32xf32>
      %cst_14 = arith.constant dense<0.000000e+00> : vector<16x32xf32>
      %14 = tpu.matmul %12, %13, %cst_14 {dimension_numbers = #tpu.dot_dimension_numbers<[1], [0], [0], [1], [0, 0, 1, 1], [], []>} : vector<16x8xf32>, vector<8x32xf32>, vector<16x32xf32> -> vector<16x32xf32>
      %c0_15 = arith.constant 0 : index
      %c0_16 = arith.constant 0 : index
      %15 = vector.load %arg8[%c0_15, %c0_16] : memref<16x32xf32, #tpu.memory_space<vmem>>, vector<16x32xf32>
      %c0_17 = arith.constant 0 : index
      %c0_18 = arith.constant 0 : index
      %16 = vector.load %arg5[%c0_17, %c0_18] : memref<1x32xf32, #tpu.memory_space<vmem>>, vector<1x32xf32>
      %17 = vector.broadcast %16 : vector<1x32xf32> to vector<16x32xf32>
      %18 = arith.addf %15, %17 : vector<16x32xf32>
      %19 = arith.addf %18, %14 : vector<16x32xf32>
      %c0_19 = arith.constant 0 : index
      %c0_20 = arith.constant 0 : index
      %20 = vector.load %arg8[%c0_19, %c0_20] : memref<16x32xf32, #tpu.memory_space<vmem>>, vector<16x32xf32>
      tpu.vector_store %arg8[%c0_19, %c0_20], %19 {strides = array<i32>} : memref<16x32xf32, #tpu.memory_space<vmem>>, vector<16x32xf32>,
    } else {
    }
    return
  }
  func.func @transform_0(%arg0: i32, %arg1: i32, %arg2: i32) -> (i32, i32) {
    %c0_i32 = arith.constant 0 : i32
    return %arg0, %arg2 : i32, i32
  }
  func.func @transform_1(%arg0: i32, %arg1: i32, %arg2: i32) -> (i32, i32) {
    %c0_i32 = arith.constant 0 : i32
    return %arg1, %arg2 : i32, i32
  }
  func.func @transform_2(%arg0: i32, %arg1: i32, %arg2: i32) -> (i32, i32) {
    %c0_i32 = arith.constant 0 : i32
    %c0_i32_0 = arith.constant 0 : i32
    return %c0_i32, %arg1 : i32, i32
  }
  func.func @transform_3(%arg0: i32, %arg1: i32, %arg2: i32) -> (i32, i32) {
    %c0_i32 = arith.constant 0 : i32
    %c0_i32_0 = arith.constant 0 : i32
    return %c0_i32, %arg1 : i32, i32
  }
  func.func @transform_4(%arg0: i32, %arg1: i32, %arg2: i32) -> (i32, i32) {
    %c0_i32 = arith.constant 0 : i32
    %c0_i32_0 = arith.constant 0 : i32
    return %arg0, %c0_i32 : i32, i32
  }
  func.func @transform_5(%arg0: i32, %arg1: i32, %arg2: i32) -> (i32, i32) {
    %c0_i32 = arith.constant 0 : i32
    return %arg0, %arg1 : i32, i32
  }
}

</mosaic_0001>

<bundles_post_ra>
// kernel: tpu_custom_call.1
= control target key start
LH: loop header
LB: loop body
LE: loop exit
PB: predicated region body
PF: predicated region fallthrough
CT: control target
= control target key end

     0   :  { %10 = vsyncpa [#allocation3], 0  ;;  %s316_s0 = inlined_call_operand.vmem [shape: f32[16,32], index: 0, kind: input, shape index: {}]   ;;  %s317_s1 = inlined_call_operand.hbm [shape: f32[32,32], index: 1, kind: input, shape index: {}]   ;;  %s318_s2 = inlined_call_operand.vmem [shape: f32[1,32], index: 2, kind: input, shape index: {}]   ;;  %s319_s3 = inlined_call_operand.vmem [shape: f32[8,32], index: 3, kind: input, shape index: {}]   ;;  %s320_s4 = inlined_call_operand.vmem [shape: f32[16,8], index: 4, kind: input, shape index: {}]   ;;  %s321_s5 = inlined_call_operand.hbm [shape: f32[16,32], index: 5, kind: output, shape index: {}]  }
   0x1   :  { %11 = vsyncpa [#allocation4], 0  ;;  %s18_s20 = sshll.u32 %s317_s1, 4  ;;  %s235_s21 = smov [#allocation2]   ;;  %s19_s20 = int_to_ptr.hbm [resolvable:$true] %s18_s20 }
   0x2   :  { %s20_s22 = sshll.u32 %s235_s21, 4  ;;  %s236_s23 = smov 128   ;;  %s21_s22 = int_to_ptr.vmem [resolvable:$true] %s20_s22 }
   0x3   :  { %s237_s24 = smov 8  }
   0x4   :  { %26 = dma.hbm_to_vmem [thread:$0]  %s19_s20, 512, %s21_s22, [#allocation3], %s236_s23, %s236_s23, %s237_s24  }
   0x5   :  { %231 = dma.done.wait [#allocation3], 512  }
   0x6   :  { %232 = vsyncadd [#allocation3], 4294966784  ;;  %vm41_vm0 = vcmask 261120   ;;  %v238_v0 = vmov 0.0   ;;  %v51_v1 = vld [vmem:[#allocation2 + $0x18] sm:$0xff]  ;;  %vm104_vm1 = vcmask 64512  }
   0x7   :  { %42 = vst.msk [vmem:[#allocation5] sm:$0xff] %vm41_vm0, %v238_v0  ;;  %165 = vmatpush.xpose.msk.msra.mxu0 %vm41_vm0, %v51_v1  ;;  %173 = vmatpush.xpose.msk.msra.mxu2 %vm41_vm0, %v51_v1  ;;  %v50_v2 = vld [vmem:[#allocation2 + $0x10] sm:$0xff]  ;;  %v103_v3 = vld [vmem:[%s319_s3] sm:$0xff]  ;;  %v49_v5 = vld [vmem:[#allocation2 + $0x8] sm:$0xff]  ;;  %s152_s12 = sshll.u32 %s321_s5, 4  ;;  %s153_s12 = int_to_ptr.hbm [resolvable:$true] %s152_s12 }
   0x8   :  { %43 = vst.msk [vmem:[#allocation5 + $0x8] sm:$0xff] %vm41_vm0, %v238_v0  ;;  %v101_v4 = vld [vmem:[%s320_s4] sm:$0xff]  ;;  %126 = vmatpush.msra.mxu1 %v103_v3  ;;  %v102_v6 = vld [vmem:[%s320_s4 + $0x8] sm:$0xff] }
   0x9   :  { %171 = vmatmul.msk.f32.vlgmr.msra.gmra.mxu1 %vm104_vm1, %v101_v4  ;;  %v48_v7 = vld [vmem:[#allocation2] sm:$0xff]  ;;  %v47_v9 = vld [vmem:[%s316_s0 + $0x8] sm:$0xff] }
   0xa   :  { %v46_v8 = vld [vmem:[%s316_s0] sm:$0xff]  ;;  %s239_s0 = smov [#allocation5]  }
   0xb   :  { %166 = vmatpush.xpose.msk.msra.mxu0 %vm41_vm0, %v50_v2  ;;  %174 = vmatpush.xpose.msk.msra.mxu2 %vm41_vm0, %v50_v2  ;;  %v182_v17 = vld [vmem:[%s318_s2] ss:$0 sm:$0xff]  ;;  %s150_s9 = sshll.u32 %s239_s0, 4  ;;  %s151_s9 = int_to_ptr.vmem [resolvable:$true] %s150_s9 }
   0xe   :  { %v44_v10 = vld [vmem:[#allocation5] sm:$0xff] }
   0xf   :  { %167 = vmatpush.xpose.msk.msra.mxu0 %vm41_vm0, %v49_v5  ;;  %175 = vmatpush.xpose.msk.msra.mxu2 %vm41_vm0, %v49_v5  ;;  %v45_v13 = vld [vmem:[#allocation5 + $0x8] sm:$0xff] }
  0x11   :  { %172 = vmatmul.msk.f32.gmra.mxu1 %vm104_vm1, %v102_v6 }
  0x13   :  { %168 = vmatpush.xpose.msk.msra.mxu0 %vm41_vm0, %v48_v7  ;;  %176 = vmatpush.xpose.msk.msra.mxu2 %vm41_vm0, %v48_v7 }
  0x16   :  { %169 = vmatmul.msk.f32.vlgmr.msra.gmra.mxu0 %vm41_vm0, %v46_v8  ;;  %170 = vmatmul.msk.f32.vlgmr.msra.gmra.mxu2 %vm41_vm0, %v47_v9 }
  0x86   :  { %v128_v15 = vpop.f32.mrf.mxu1 }
  0x8e   :  { %v131_v21 = vpop.f32.mrf.mxu1 }
  0x93   :  { %v88_v11 = vpop.f32.mrf.mxu0 }
  0x94   :  { %v94_v12 = vadd.f32 %v88_v11, %v44_v10 }
  0x96   :  { %96 = vst.msk [vmem:[#allocation5] sm:$0xff] %vm41_vm0, %v94_v12 }
  0x99   :  { %v91_v14 = vpop.f32.mrf.mxu2 }
  0x9a   :  { %v95_v16 = vadd.f32 %v91_v14, %v45_v13 }
  0x9c   :  { %97 = vst.msk [vmem:[#allocation5 + $0x8] sm:$0xff] %vm41_vm0, %v95_v16 }
  0x9d   :  { %v134_v18 = vld [vmem:[#allocation5] sm:$0xff] }
  0x9e   :  { %v140_v19 = vadd.f32 %v182_v17, %v134_v18 }
  0xa0   :  { %v142_v20 = vadd.f32 %v140_v19, %v128_v15 }
  0xa2   :  { %144 = vst.msk [vmem:[#allocation5] sm:$0xff] %vm41_vm0, %v142_v20 }
  0xa3   :  { %v135_v22 = vld [vmem:[#allocation5 + $0x8] sm:$0xff] }
  0xa4   :  { %v141_v23 = vadd.f32 %v182_v17, %v135_v22 }
  0xa6   :  { %v143_v24 = vadd.f32 %v141_v23, %v131_v21 }
  0xa8   :  { %145 = vst.msk [vmem:[#allocation5 + $0x8] sm:$0xff] %vm41_vm0, %v143_v24 }
  0xa9   :  { %158 = dma.vmem_to_hbm [thread:$0]  %s151_s9, 256, %s153_s12, [#allocation4], %s236_s23, %s236_s23, %s237_s24  }
  0xaa   :  { %233 = dma.done.wait [#allocation4], 256  }
  0xab   :  { %234 = vsyncadd [#allocation4], 4294967040 }
  0xac   :  { %163 = vsyncpa [#allocation3], 1 }
  0xad   :  { %164 = vsyncpa [#allocation4], 1 }

</bundles_post_ra>
